<compile_context>
chip_gen: v7x
topology: tpu7x:2x2x1
jax: 0.10.0
libtpu: 0.0.40
codegen_flags: <defaults>
</compile_context>

<pallas_src>
import jax
import jax.numpy as jnp
from jax.experimental import pallas as pl
from jax.experimental.pallas import tpu as pltpu


def mha_kernel(x_ref, wq_ref, wk_ref, wv_ref, bq_ref, bk_ref, bv_ref,
               wout_ref, bout_ref, o_ref, acc_ref):
    h = pl.program_id(1)
    cdt = x_ref.dtype                      # native activation dtype (e.g. bf16)

    x = x_ref[0]                           # (N, D) -- no f32 upcast

    # Per-head projections: full-D contraction, f32 accumulation.
    # Softmax scale is already folded into wq/bq by the wrapper.
    q = jnp.dot(x, wq_ref[0], preferred_element_type=jnp.float32) + bq_ref[0]
    k = jnp.dot(x, wk_ref[0], preferred_element_type=jnp.float32) + bk_ref[0]
    v = jnp.dot(x, wv_ref[0], preferred_element_type=jnp.float32) + bv_ref[0]

    # Scaled dot-product attention; softmax intermediates stay in f32.
    # dot_general contracts the hd axis of q and k directly (no explicit .T).
    s = jax.lax.dot_general(q.astype(cdt), k.astype(cdt),
                            (((1,), (1,)), ((), ())),
                            preferred_element_type=jnp.float32)     # (N, N)
    s = s - jnp.max(s, axis=-1, keepdims=True)
    p = jnp.exp(s)
    denom = jnp.sum(p, axis=-1, keepdims=True)                      # (N, 1)
    pv = jnp.dot(p.astype(cdt), v.astype(cdt),
                 preferred_element_type=jnp.float32)                # (N, hd)
    o_h = pv * pl.reciprocal(denom, approx=True)  # normalize after PV (EUP)

    # Accumulate the output projection head-by-head into an f32 scratch.
    @pl.when(h == 0)
    def _init():
        acc_ref[...] = jnp.zeros_like(acc_ref)

    acc_ref[...] += jnp.dot(o_h.astype(cdt), wout_ref[0],
                            preferred_element_type=jnp.float32)     # (N, D)

    @pl.when(h == pl.num_programs(1) - 1)
    def _finalize():
        o_ref[0] = (acc_ref[...] + bout_ref[...].astype(jnp.float32)
                    ).astype(o_ref.dtype)


def multi_head_attention(x, wqkv_t, bqkv, wout_t, bout, num_heads):
    """x: (B, N, D); wqkv_t: (D, 3D); bqkv: (3D,); wout_t: (D, D); bout: (D,).

    Weights are pre-transposed to (in_features, out_features), matching
    `y = x @ W + b`.  The per-head weight re-layouts below are cheap XLA ops
    and in a real deployment would be done once at parameter-load time.
    """
    B, N, D = x.shape
    assert D % num_heads == 0, "embedding dim must be divisible by num_heads"
    hd = D // num_heads
    scale = hd ** (-0.5)
    pdt = wqkv_t.dtype

    # Split the fused QKV weight into per-head slabs (H, D, hd).  Column
    # h*hd:(h+1)*hd of each Q/K/V section belongs to head h, matching the
    # PyTorch reshape(B,N,3,H,hd).permute(2,0,3,1,4) split.
    def per_head_w(w):                      # (D, D) -> (H, D, hd)
        return jnp.transpose(w.reshape(D, num_heads, hd), (1, 0, 2))

    def per_head_b(b):                      # (D,) -> (H, 1, hd)
        return b.reshape(num_heads, 1, hd)

    wq_h = (per_head_w(wqkv_t[:, 0 * D:1 * D]) * scale).astype(pdt)  # fold scale
    wk_h = per_head_w(wqkv_t[:, 1 * D:2 * D])
    wv_h = per_head_w(wqkv_t[:, 2 * D:3 * D])
    bq_h = (per_head_b(bqkv[0 * D:1 * D]) * scale).astype(pdt)       # fold scale
    bk_h = per_head_b(bqkv[1 * D:2 * D])
    bv_h = per_head_b(bqkv[2 * D:3 * D])
    wout_h = wout_t.reshape(num_heads, hd, D)   # head h -> rows h*hd:(h+1)*hd
    bout2 = bout.reshape(1, D)

    return pl.pallas_call(
        mha_kernel,
        out_shape=jax.ShapeDtypeStruct((B, N, D), x.dtype),
        grid=(B, num_heads),
        in_specs=[
            pl.BlockSpec((1, N, D), lambda b, h: (b, 0, 0)),   # x (resident across heads)
            pl.BlockSpec((1, D, hd), lambda b, h: (h, 0, 0)),  # Wq head slab (scaled)
            pl.BlockSpec((1, D, hd), lambda b, h: (h, 0, 0)),  # Wk head slab
            pl.BlockSpec((1, D, hd), lambda b, h: (h, 0, 0)),  # Wv head slab
            pl.BlockSpec((1, 1, hd), lambda b, h: (h, 0, 0)),  # bq (scaled)
            pl.BlockSpec((1, 1, hd), lambda b, h: (h, 0, 0)),  # bk
            pl.BlockSpec((1, 1, hd), lambda b, h: (h, 0, 0)),  # bv
            pl.BlockSpec((1, hd, D), lambda b, h: (h, 0, 0)),  # Wout head rows
            pl.BlockSpec((1, D), lambda b, h: (0, 0)),         # bout
        ],
        out_specs=pl.BlockSpec((1, N, D), lambda b, h: (b, 0, 0)),
        scratch_shapes=[pltpu.VMEM((N, D), jnp.float32)],      # out-proj accumulator
        compiler_params=pltpu.CompilerParams(
            dimension_semantics=("parallel", "arbitrary")),
    )(x, wq_h, wk_h, wv_h, bq_h, bk_h, bv_h, wout_h, bout2)


def reference_mha(x, wqkv_t, bqkv, wout_t, bout, num_heads):
    """Pure-JAX replica of the PyTorch forward (for validation)."""
    B, N, D = x.shape
    hd = D // num_heads
    scale = hd ** (-0.5)
    qkv = x @ wqkv_t + bqkv                                   # (B, N, 3D)
    qkv = qkv.reshape(B, N, 3, num_heads, hd).transpose(2, 0, 3, 1, 4)
    q, k, v = qkv[0], qkv[1], qkv[2]                          # (B, H, N, hd)
    scores = jnp.einsum('bhqd,bhkd->bhqk', q, k) * scale
    attn = jax.nn.softmax(scores, axis=-1)
    out = jnp.einsum('bhqk,bhkd->bhqd', attn, v)              # (B, H, N, hd)
    out = out.transpose(0, 2, 1, 3).reshape(B, N, D)
    return out @ wout_t + bout


if __name__ == "__main__":
    B, N, D = 2, 8, 32
    num_heads = 4

    key = jax.random.PRNGKey(0)
    kx, kw1, kb1, kw2, kb2 = jax.random.split(key, 5)

    x = jax.random.normal(kx, (B, N, D), dtype=jnp.float32)

    # Deterministic parameter init (PyTorch Linear-style uniform bounds).
    bound = 1.0 / (D ** 0.5)
    wqkv_t = jax.random.uniform(kw1, (D, 3 * D), jnp.float32, -bound, bound)
    bqkv = jax.random.uniform(kb1, (3 * D,), jnp.float32, -bound, bound)
    wout_t = jax.random.uniform(kw2, (D, D), jnp.float32, -bound, bound)
    bout = jax.random.uniform(kb2, (D,), jnp.float32, -bound, bound)

    # f32 run: tight check against the pure-JAX reference.
    y = jax.block_until_ready(
        multi_head_attention(x, wqkv_t, bqkv, wout_t, bout, num_heads))
    y_ref = reference_mha(x, wqkv_t, bqkv, wout_t, bout, num_heads)
    assert y.shape == (B, N, D)
    assert jnp.allclose(y, y_ref, atol=2e-2, rtol=2e-2), "f32 mismatch vs reference"

    # bf16 run: the intended fast path (bf16 operands, f32 accumulation).
    bf = lambda a: a.astype(jnp.bfloat16)
    y16 = jax.block_until_ready(
        multi_head_attention(bf(x), bf(wqkv_t), bf(bqkv), bf(wout_t), bf(bout),
                             num_heads))
    y16_ref = reference_mha(bf(x).astype(jnp.float32),
                            bf(wqkv_t).astype(jnp.float32),
                            bf(bqkv).astype(jnp.float32),
                            bf(wout_t).astype(jnp.float32),
                            bf(bout).astype(jnp.float32), num_heads)
    assert y16.shape == (B, N, D)
    assert jnp.allclose(y16.astype(jnp.float32), y16_ref, atol=1e-1, rtol=1e-1), \
        "bf16 mismatch vs reference"

    print("KERNEL_OK")
</pallas_src>

<mosaic_0001>
module attributes {stable_mosaic.version = 11 : i64} {
  func.func @mha_kernel(%arg0: i32, %arg1: i32, %arg2: memref<1x8x32xf32, #tpu.memory_space<vmem>>, %arg3: memref<1x32x8xf32, #tpu.memory_space<vmem>>, %arg4: memref<1x32x8xf32, #tpu.memory_space<vmem>>, %arg5: memref<1x32x8xf32, #tpu.memory_space<vmem>>, %arg6: memref<1x1x8xf32, #tpu.memory_space<vmem>>, %arg7: memref<1x1x8xf32, #tpu.memory_space<vmem>>, %arg8: memref<1x1x8xf32, #tpu.memory_space<vmem>>, %arg9: memref<1x8x32xf32, #tpu.memory_space<vmem>>, %arg10: memref<1x32xf32, #tpu.memory_space<vmem>>, %arg11: memref<1x8x32xf32, #tpu.memory_space<vmem>>, %arg12: memref<8x32xf32, #tpu.memory_space<vmem>>) attributes {dimension_semantics = [#tpu.dimension_semantics<parallel>, #tpu.dimension_semantics<arbitrary>], iteration_bounds = array<i64: 2, 4>, scalar_prefetch = 0 : i64, scratch_operands = 1 : i64, tpu.core_type = #tpu.core_type<tc>, window_params = [{transform_indices = @transform_0, window_bounds = array<i64: 1, 8, 32>}, {transform_indices = @transform_1, window_bounds = array<i64: 1, 32, 8>}, {transform_indices = @transform_2, window_bounds = array<i64: 1, 32, 8>}, {transform_indices = @transform_3, window_bounds = array<i64: 1, 32, 8>}, {transform_indices = @transform_4, window_bounds = array<i64: 1, 1, 8>}, {transform_indices = @transform_5, window_bounds = array<i64: 1, 1, 8>}, {transform_indices = @transform_6, window_bounds = array<i64: 1, 1, 8>}, {transform_indices = @transform_7, window_bounds = array<i64: 1, 8, 32>}, {pipeline_mode = #tpu.pipeline_mode<synchronous>, transform_indices = @transform_8, window_bounds = array<i64: 1, 32>}, {transform_indices = @transform_9, window_bounds = array<i64: 1, 8, 32>}]} {
    %c0 = arith.constant 0 : index
    %c0_0 = arith.constant 0 : index
    %c0_1 = arith.constant 0 : index
    %0 = vector.load %arg2[%c0, %c0_0, %c0_1] : memref<1x8x32xf32, #tpu.memory_space<vmem>>, vector<1x8x32xf32>
    %1 = vector.shape_cast %0 : vector<1x8x32xf32> to vector<8x32xf32>
    %c0_2 = arith.constant 0 : index
    %c0_3 = arith.constant 0 : index
    %c0_4 = arith.constant 0 : index
    %2 = vector.load %arg3[%c0_2, %c0_3, %c0_4] : memref<1x32x8xf32, #tpu.memory_space<vmem>>, vector<1x32x8xf32>
    %3 = vector.shape_cast %2 : vector<1x32x8xf32> to vector<32x8xf32>
    %cst = arith.constant dense<0.000000e+00> : vector<8x8xf32>
    %4 = tpu.matmul %1, %3, %cst {dimension_numbers = #tpu.dot_dimension_numbers<[1], [0], [0], [1], [0, 0, 1, 1], [], []>} : vector<8x32xf32>, vector<32x8xf32>, vector<8x8xf32> -> vector<8x8xf32>
    %c0_5 = arith.constant 0 : index
    %c0_6 = arith.constant 0 : index
    %c0_7 = arith.constant 0 : index
    %5 = vector.load %arg6[%c0_5, %c0_6, %c0_7] : memref<1x1x8xf32, #tpu.memory_space<vmem>>, vector<1x1x8xf32>
    %6 = vector.shape_cast %5 : vector<1x1x8xf32> to vector<1x8xf32>
    %7 = vector.broadcast %6 : vector<1x8xf32> to vector<8x8xf32>
    %8 = arith.addf %4, %7 : vector<8x8xf32>
    %c0_8 = arith.constant 0 : index
    %c0_9 = arith.constant 0 : index
    %c0_10 = arith.constant 0 : index
    %9 = vector.load %arg4[%c0_8, %c0_9, %c0_10] : memref<1x32x8xf32, #tpu.memory_space<vmem>>, vector<1x32x8xf32>
    %10 = vector.shape_cast %9 : vector<1x32x8xf32> to vector<32x8xf32>
    %cst_11 = arith.constant dense<0.000000e+00> : vector<8x8xf32>
    %11 = tpu.matmul %1, %10, %cst_11 {dimension_numbers = #tpu.dot_dimension_numbers<[1], [0], [0], [1], [0, 0, 1, 1], [], []>} : vector<8x32xf32>, vector<32x8xf32>, vector<8x8xf32> -> vector<8x8xf32>
    %c0_12 = arith.constant 0 : index
    %c0_13 = arith.constant 0 : index
    %c0_14 = arith.constant 0 : index
    %12 = vector.load %arg7[%c0_12, %c0_13, %c0_14] : memref<1x1x8xf32, #tpu.memory_space<vmem>>, vector<1x1x8xf32>
    %13 = vector.shape_cast %12 : vector<1x1x8xf32> to vector<1x8xf32>
    %14 = vector.broadcast %13 : vector<1x8xf32> to vector<8x8xf32>
    %15 = arith.addf %11, %14 : vector<8x8xf32>
    %c0_15 = arith.constant 0 : index
    %c0_16 = arith.constant 0 : index
    %c0_17 = arith.constant 0 : index
    %16 = vector.load %arg5[%c0_15, %c0_16, %c0_17] : memref<1x32x8xf32, #tpu.memory_space<vmem>>, vector<1x32x8xf32>
    %17 = vector.shape_cast %16 : vector<1x32x8xf32> to vector<32x8xf32>
    %cst_18 = arith.constant dense<0.000000e+00> : vector<8x8xf32>
    %18 = tpu.matmul %1, %17, %cst_18 {dimension_numbers = #tpu.dot_dimension_numbers<[1], [0], [0], [1], [0, 0, 1, 1], [], []>} : vector<8x32xf32>, vector<32x8xf32>, vector<8x8xf32> -> vector<8x8xf32>
    %c0_19 = arith.constant 0 : index
    %c0_20 = arith.constant 0 : index
    %c0_21 = arith.constant 0 : index
    %19 = vector.load %arg8[%c0_19, %c0_20, %c0_21] : memref<1x1x8xf32, #tpu.memory_space<vmem>>, vector<1x1x8xf32>
    %20 = vector.shape_cast %19 : vector<1x1x8xf32> to vector<1x8xf32>
    %21 = vector.broadcast %20 : vector<1x8xf32> to vector<8x8xf32>
    %22 = arith.addf %18, %21 : vector<8x8xf32>
    %cst_22 = arith.constant dense<0.000000e+00> : vector<8x8xf32>
    %23 = tpu.matmul %8, %15, %cst_22 {dimension_numbers = #tpu.dot_dimension_numbers<[1], [1], [0], [0], [0, 0, 1, 0], [], []>} : vector<8x8xf32>, vector<8x8xf32>, vector<8x8xf32> -> vector<8x8xf32>
    %cst_23 = arith.constant dense<0xFF800000> : vector<8xf32>
    %24 = vector.multi_reduction <maximumf>, %23, %cst_23 [1] : vector<8x8xf32> to vector<8xf32>
    %25 = vector.shape_cast %24 : vector<8xf32> to vector<8x1xf32>
    %26 = vector.broadcast %25 : vector<8x1xf32> to vector<8x8xf32>
    %27 = arith.subf %23, %26 : vector<8x8xf32>
    %28 = math.exp %27 : vector<8x8xf32>
    %cst_24 = arith.constant dense<0.000000e+00> : vector<8xf32>
    %29 = vector.multi_reduction <add>, %28, %cst_24 [1] : vector<8x8xf32> to vector<8xf32>
    %30 = vector.shape_cast %29 : vector<8xf32> to vector<8x1xf32>
    %cst_25 = arith.constant dense<0.000000e+00> : vector<8x8xf32>
    %31 = tpu.matmul %28, %22, %cst_25 {dimension_numbers = #tpu.dot_dimension_numbers<[1], [0], [0], [1], [0, 0, 1, 1], [], []>} : vector<8x8xf32>, vector<8x8xf32>, vector<8x8xf32> -> vector<8x8xf32>
    %32 = tpu.reciprocal %30 {approx = true} : vector<8x1xf32> -> vector<8x1xf32>
    %33 = vector.broadcast %32 : vector<8x1xf32> to vector<8x8xf32>
    %34 = arith.mulf %31, %33 : vector<8x8xf32>
    %c0_i32 = arith.constant 0 : i32
    %35 = arith.cmpi eq, %arg1, %c0_i32 : i32
    %36 = arith.extui %35 : i1 to i32
    %c0_i32_26 = arith.constant 0 : i32
    %37 = arith.cmpi ne, %36, %c0_i32_26 : i32
    scf.if %37 {
      %cst_36 = arith.constant 0.000000e+00 : f32
      %47 = vector.broadcast %cst_36 : f32 to vector<8x32xf32>
      %c0_37 = arith.constant 0 : index
      %c0_38 = arith.constant 0 : index
      %48 = vector.load %arg12[%c0_37, %c0_38] : memref<8x32xf32, #tpu.memory_space<vmem>>, vector<8x32xf32>
      tpu.vector_store %arg12[%c0_37, %c0_38], %47 {strides = array<i32>} : memref<8x32xf32, #tpu.memory_space<vmem>>, vector<8x32xf32>,
    } else {
    }
    %c0_27 = arith.constant 0 : index
    %c0_28 = arith.constant 0 : index
    %38 = vector.load %arg12[%c0_27, %c0_28] : memref<8x32xf32, #tpu.memory_space<vmem>>, vector<8x32xf32>
    %c0_29 = arith.constant 0 : index
    %c0_30 = arith.constant 0 : index
    %c0_31 = arith.constant 0 : index
    %39 = vector.load %arg9[%c0_29, %c0_30, %c0_31] : memref<1x8x32xf32, #tpu.memory_space<vmem>>, vector<1x8x32xf32>
    %40 = vector.shape_cast %39 : vector<1x8x32xf32> to vector<8x32xf32>
    %cst_32 = arith.constant dense<0.000000e+00> : vector<8x32xf32>
    %41 = tpu.matmul %34, %40, %cst_32 {dimension_numbers = #tpu.dot_dimension_numbers<[1], [0], [0], [1], [0, 0, 1, 1], [], []>} : vector<8x8xf32>, vector<8x32xf32>, vector<8x32xf32> -> vector<8x32xf32>
    %42 = arith.addf %38, %41 : vector<8x32xf32>
    %c0_33 = arith.constant 0 : index
    %c0_34 = arith.constant 0 : index
    %43 = vector.load %arg12[%c0_33, %c0_34] : memref<8x32xf32, #tpu.memory_space<vmem>>, vector<8x32xf32>
    tpu.vector_store %arg12[%c0_33, %c0_34], %42 {strides = array<i32>} : memref<8x32xf32, #tpu.memory_space<vmem>>, vector<8x32xf32>,
    %c3_i32 = arith.constant 3 : i32
    %44 = arith.cmpi eq, %arg1, %c3_i32 : i32
    %45 = arith.extui %44 : i1 to i32
    %c0_i32_35 = arith.constant 0 : i32
    %46 = arith.cmpi ne, %45, %c0_i32_35 : i32
    scf.if %46 {
      %c0_36 = arith.constant 0 : index
      %c0_37 = arith.constant 0 : index
      %47 = vector.load %arg12[%c0_36, %c0_37] : memref<8x32xf32, #tpu.memory_space<vmem>>, vector<8x32xf32>
      %c0_38 = arith.constant 0 : index
      %c0_39 = arith.constant 0 : index
      %48 = vector.load %arg10[%c0_38, %c0_39] : memref<1x32xf32, #tpu.memory_space<vmem>>, vector<1x32xf32>
      %49 = vector.broadcast %48 : vector<1x32xf32> to vector<8x32xf32>
      %50 = arith.addf %47, %49 : vector<8x32xf32>
      %c0_40 = arith.constant 0 : index
      %c0_41 = arith.constant 0 : index
      %c0_42 = arith.constant 0 : index
      %51 = vector.load %arg11[%c0_40, %c0_41, %c0_42] : memref<1x8x32xf32, #tpu.memory_space<vmem>>, vector<1x8x32xf32>
      %52 = vector.shape_cast %51 : vector<1x8x32xf32> to vector<8x32xf32>
      %53 = vector.shape_cast %50 : vector<8x32xf32> to vector<1x8x32xf32>
      tpu.vector_store %arg11[%c0_40, %c0_41, %c0_42], %53 {strides = array<i32>} : memref<1x8x32xf32, #tpu.memory_space<vmem>>, vector<1x8x32xf32>,
    } else {
    }
    return
  }
  func.func @transform_0(%arg0: i32, %arg1: i32) -> (i32, i32, i32) {
    %c0_i32 = arith.constant 0 : i32
    %c0_i32_0 = arith.constant 0 : i32
    %c0_i32_1 = arith.constant 0 : i32
    return %arg0, %c0_i32, %c0_i32_0 : i32, i32, i32
  }
  func.func @transform_1(%arg0: i32, %arg1: i32) -> (i32, i32, i32) {
    %c0_i32 = arith.constant 0 : i32
    %c0_i32_0 = arith.constant 0 : i32
    %c0_i32_1 = arith.constant 0 : i32
    return %arg1, %c0_i32, %c0_i32_0 : i32, i32, i32
  }
  func.func @transform_2(%arg0: i32, %arg1: i32) -> (i32, i32, i32) {
    %c0_i32 = arith.constant 0 : i32
    %c0_i32_0 = arith.constant 0 : i32
    %c0_i32_1 = arith.constant 0 : i32
    return %arg1, %c0_i32, %c0_i32_0 : i32, i32, i32
  }
  func.func @transform_3(%arg0: i32, %arg1: i32) -> (i32, i32, i32) {
    %c0_i32 = arith.constant 0 : i32
    %c0_i32_0 = arith.constant 0 : i32
    %c0_i32_1 = arith.constant 0 : i32
    return %arg1, %c0_i32, %c0_i32_0 : i32, i32, i32
  }
  func.func @transform_4(%arg0: i32, %arg1: i32) -> (i32, i32, i32) {
    %c0_i32 = arith.constant 0 : i32
    %c0_i32_0 = arith.constant 0 : i32
    %c0_i32_1 = arith.constant 0 : i32
    return %arg1, %c0_i32, %c0_i32_0 : i32, i32, i32
  }
  func.func @transform_5(%arg0: i32, %arg1: i32) -> (i32, i32, i32) {
    %c0_i32 = arith.constant 0 : i32
    %c0_i32_0 = arith.constant 0 : i32
    %c0_i32_1 = arith.constant 0 : i32
    return %arg1, %c0_i32, %c0_i32_0 : i32, i32, i32
  }
  func.func @transform_6(%arg0: i32, %arg1: i32) -> (i32, i32, i32) {
    %c0_i32 = arith.constant 0 : i32
    %c0_i32_0 = arith.constant 0 : i32
    %c0_i32_1 = arith.constant 0 : i32
    return %arg1, %c0_i32, %c0_i32_0 : i32, i32, i32
  }
  func.func @transform_7(%arg0: i32, %arg1: i32) -> (i32, i32, i32) {
    %c0_i32 = arith.constant 0 : i32
    %c0_i32_0 = arith.constant 0 : i32
    %c0_i32_1 = arith.constant 0 : i32
    return %arg1, %c0_i32, %c0_i32_0 : i32, i32, i32
  }
  func.func @transform_8(%arg0: i32, %arg1: i32) -> (i32, i32) {
    %c0_i32 = arith.constant 0 : i32
    %c0_i32_0 = arith.constant 0 : i32
    %c0_i32_1 = arith.constant 0 : i32
    return %c0_i32, %c0_i32_0 : i32, i32
  }
  func.func @transform_9(%arg0: i32, %arg1: i32) -> (i32, i32, i32) {
    %c0_i32 = arith.constant 0 : i32
    %c0_i32_0 = arith.constant 0 : i32
    %c0_i32_1 = arith.constant 0 : i32
    return %arg0, %c0_i32, %c0_i32_0 : i32, i32, i32
  }
}

</mosaic_0001>

<bundles_post_ra>
// kernel: tpu_custom_call.1
= control target key start
LH: loop header
LB: loop body
LE: loop exit
PB: predicated region body
PF: predicated region fallthrough
CT: control target
= control target key end

     0   :  { %14 = vsyncpa [#allocation4], 0  ;;  %s1677_s0 = inlined_call_operand.vmem [shape: f32[2,8,32], index: 0, kind: input, shape index: {}]   ;;  %s1678_s1 = inlined_call_operand.vmem [shape: f32[4,32,8], index: 1, kind: input, shape index: {}]   ;;  %s1679_s2 = inlined_call_operand.vmem [shape: f32[4,32,8], index: 2, kind: input, shape index: {}]   ;;  %s1680_s3 = inlined_call_operand.vmem [shape: f32[4,32,8], index: 3, kind: input, shape index: {}]   ;;  %s1681_s4 = inlined_call_operand.vmem [shape: f32[4,1,8], index: 4, kind: input, shape index: {}]   ;;  %s1682_s5 = inlined_call_operand.vmem [shape: f32[4,1,8], index: 5, kind: input, shape index: {}]   ;;  %s1683_s6 = inlined_call_operand.vmem [shape: f32[4,1,8], index: 6, kind: input, shape index: {}]   ;;  %s1684_s7 = inlined_call_operand.vmem [shape: f32[4,8,32], index: 7, kind: input, shape index: {}]   ;;  %s1685_s8 = inlined_call_operand.vmem [shape: f32[1,32], index: 8, kind: input, shape index: {}]   ;;  %s1686_s9 = inlined_call_operand.hbm [shape: f32[2,8,32], index: 9, kind: output, shape index: {}]  }
   0x1   :  { %16 = vsyncpa [#allocation4 + $0x1], 0  ;;  %s1474_s30 = smov 0   ;;  %s1476_s10 = smov 0  }
   0x2   :  { %s1478_s11 = smov 0   ;;  %s1480_s12 = smov 0  }
   0x3   :  { %s1482_s13 = smov 0   ;;  %s1484_s14 = smov 0  }
   0x4   :  { %s1486_s15 = smov 0   ;;  %s1488_s16 = smov 0  }
   0x5 LB: > { %1692 = sst [smem:[#allocation6_spill]] %s1397_s11  ;;  %s1123_s17 = sadd.s32 4294967295, %s1417_s16   ;;  %s1417_s16 = sphi %s1488_s16, %s22_s16   ;;  %s1413_s15 = sphi %s1486_s15, %s1706_s15   ;;  %s1409_s14 = sphi %s1484_s14, %s1705_s14   ;;  %s1405_s13 = sphi %s1482_s13, %s1704_s13   ;;  %s1401_s12 = sphi %s1480_s12, %s1703_s12   ;;  %s1397_s11 = sphi %s1478_s11, %s1702_s11   ;;  %s1393_s10 = sphi %s1476_s10, %s1708_s10   ;;  %s1389_s30 = sphi %s1474_s30, %s1707_s30  }
   0x6   : > { %1693 = sst [smem:[#allocation7_spill]] %s1409_s14  ;;  %s1124_s18 = sadd.s32 4294967294, %s1417_s16  }
   0x7   : > { %1694 = sst [smem:[#allocation8_spill]] %s1413_s15  ;;  %s31_s19 = sadd.s32 1, %s1409_s14 }
   0x8   : > { %p32_p0 = scmp.ge.s32.totalorder %s31_s19, 4  ;;  %s34_s20 = sadd.s32 1, %s1413_s15 }
   0x9   : > { %p280_p1 = scmp.ne.s32.totalorder %s1397_s11, %s1393_s10  ;;  %p281_p2 = scmp.eq.s32.totalorder %s1123_s17, 7 }
   0xa   : > { %s1710_s19 = smov (%p32_p0, %s31_s19), 0  ;;  %s1712_s20 = smov (!%p32_p0, %s34_s20), %s1413_s15 }
   0xb   : > { %1695 = sst [smem:[#allocation9_spill]] %s1710_s19  ;;  %p1523_p3 = por %p281_p2, %p280_p1 }
   0xc   : > { %p286_p4 = scmp.ne.s32.totalorder %s1393_s10, %s1389_s30  ;;  %p36_p5 = scmp.ge.s32.totalorder %s1712_s20, 2 }
   0xd   : > { %p287_p6 = scmp.eq.s32.totalorder %s1124_s18, 7  ;;  %p1127_p7 = scmp.ge.s32.totalorder %s1417_s16, 1 }
   0xe   : > { %p364_p8 = scmp.lt.s32.totalorder %s1417_s16, 9  ;;  %s1714_s20 = smov (%p36_p5, %s1712_s20), 0 }
   0xf   : > { %1697 = sst [smem:[#allocation10_spill]] %s1714_s20  ;;  %p1533_p9 = por %p287_p6, %p286_p4 }
  0x10   : > { %p365_p10 = pnand %p1127_p7, %p364_p8  ;;  %s267_s23 = ssub.s32 %s1413_s15, %s1714_s20 }
  0x11   : > { %s270_s24 = sadd.s32 1, %s1397_s11  ;;  %p268_p11 = scmp.eq.s32.totalorder %s267_s23, 0  ;;  %v1419_v0 = vmov (!%p365_p10), 0.0|0.0   ;;  %vm1420_vm0 = vmmov (!%p365_p10), 0   ;;  %v1421_v1 = vmov (!%p365_p10), 0.0   ;;  %vm471_vm1 = vcmask (!%p365_p10), 261120  }
  0x12   : > { %368 = sbr.rel (%p365_p10) target bundleno = 1091 (0x443), region = 56  ;;  %p431_p12 = scmp.lt.s32.totalorder (!%p365_p10), %s1401_s12, 3  ;;  %1232 = vmatprep.subr.bf16.mxu1 (!%p365_p10), %v1419_v0  ;;  %1226 = vmatprep.subr.bf16.mxu0 (!%p365_p10), %v1419_v0  ;;  %vm707_vm2 = vcmask (!%p365_p10), 64512  }
  0x13   : > { %s1541_s25 = scalar_select %p268_p11, %s1397_s11, %s270_s24  }
  0x14   : > { %s1687_s26 = sand.u32 (!%p365_p10), 1, %s1393_s10   ;;  %1197 = vmatprep.mubr.msk.f32.mxu1 (!%p365_p10), %vm1420_vm0, %v1421_v1  ;;  %1186 = vmatprep.mubr.msk.f32.mxu0 (!%p365_p10), %vm1420_vm0, %v1421_v1  ;;  %p427_p13 = scmp.lt.s32.totalorder (!%p365_p10), %s1405_s13, 1 }
  0x15   : > { %1699 = sst [smem:[#allocation11_spill]] %s1541_s25  ;;  %s1547_s27 = sshll.u32 (!%p365_p10), %s1687_s26, 3 }
  0x16   : > { %p1146_p0 = scmp.ne.s32.totalorder (!%p365_p10), %s1401_s12, 0 }
  0x19   : > { %s1550_s28 = scalar_select %p431_p12, %s1401_s12, 3 }
  0x1a   : > { %s428_s11 = scalar_select %p427_p13, %s1405_s13, 1 }
  0x1b   : > { %s1558_s29 = sshll.u32 %s1550_s28, 5  ;;  %s1136_s17 = sshll.u32 %s1550_s28, 3  ;;  %v1422_v46 = vmov (!%p1146_p0), 0.0  }
  0x1c   : > { %s440_s24 = scalar_lea.vmem %s1679_s2, %s1558_s29  ;;  %s1568_s19 = scalar_lea.vmem %s1684_s7, %s1136_s17  ;;  %872 = vst.msk [vmem:[#allocation2] sm:$0xff] (!%p1146_p0), %vm471_vm1, %v1422_v46 }
  0x1d   : > { %v545_v2 = vld [vmem:[%s440_s24] sm:$0xff]  ;;  %v546_v3 = vld [vmem:[%s440_s24 + $0x8] sm:$0xff]  ;;  %s435_s25 = scalar_lea.vmem %s1678_s1, %s1558_s29  ;;  %v547_v4 = vld [vmem:[%s440_s24 + $0x10] sm:$0xff]  ;;  %s1129_s20 = sshll.u32 %s428_s11, 3 }
  0x1e   : > { %v1233_v5 = vpack.c.bf16 %v546_v3, %v545_v2  ;;  %v460_v6 = vld [vmem:[%s435_s25] sm:$0xff]  ;;  %v461_v7 = vld [vmem:[%s435_s25 + $0x8] sm:$0xff]  ;;  %v548_v8 = vld [vmem:[%s440_s24 + $0x18] sm:$0xff]  ;;  %s430_s14 = scalar_lea.vmem %s1677_s0, %s1129_s20  ;;  %s451_s24 = scalar_lea.vmem %s1682_s5, %s1550_s28 }
  0x1f   : > { %v1227_v9 = vpack.c.bf16 %v461_v7, %v460_v6  ;;  %v462_v10 = vld [vmem:[%s435_s25 + $0x10] sm:$0xff]  ;;  %v463_v11 = vld [vmem:[%s435_s25 + $0x18] sm:$0xff]  ;;  %v1236_v12 = vpack.c.bf16 %v548_v8, %v547_v4  ;;  %v459_v14 = vld [vmem:[%s430_s14] sm:$0xff]  ;;  %s445_s25 = scalar_lea.vmem %s1680_s3, %s1558_s29  ;;  %s448_s17 = scalar_lea.vmem %s1681_s4, %s1550_s28 }
  0x20   : > { %1234 = vmatpush3.bf16.msra.mxu1 %v1233_v5  ;;  %v1230_v13 = vpack.c.bf16 %v463_v11, %v462_v10  ;;  %v626_v15 = vld [vmem:[%s445_s25] sm:$0xff]  ;;  %v627_v16 = vld [vmem:[%s445_s25 + $0x8] sm:$0xff]  ;;  %v628_v17 = vld [vmem:[%s445_s25 + $0x10] sm:$0xff]  ;;  %s454_s11 = scalar_lea.vmem %s1683_s6, %s1550_s28  ;;  %s426_s28 = scalar_lea.vmem [#allocation3], %s1547_s27 }
  0x21   : > { %1228 = vmatpush3.bf16.msra.mxu0 %v1227_v9  ;;  %1235 = vmatprep.subr.bf16.mxu1 %v1419_v0  ;;  %v1239_v18 = vpack.c.bf16 %v627_v16, %v626_v15  ;;  %v629_v19 = vld [vmem:[%s445_s25 + $0x18] sm:$0xff]  ;;  %v1139_v21 = vld [vmem:[%s451_s24] ss:$0 sm:$0xff] }
  0x22   : > { %1229 = vmatprep.subr.bf16.mxu0 %v1419_v0  ;;  %v1242_v20 = vpack.c.bf16 %v629_v19, %v628_v17  ;;  %v1137_v22 = vld [vmem:[%s448_s17] ss:$0 sm:$0xff] }
  0x23   : > { %v1141_v33 = vld [vmem:[%s454_s11] ss:$0 sm:$0xff] }
  0x24   : > { %1237 = vmatpush3.bf16.msra.mxu1 %v1236_v12 }
  0x25   : > { %1231 = vmatpush3.bf16.msra.mxu0 %v1230_v13  ;;  %1211 = vmatprep.subr.mxu1 %v1421_v1 }
  0x26   : > { %1238 = vmatprep.subr.bf16.mxu0 %v1419_v0 }
  0x27   : > { %1198 = vmatmul.mubr.msk.f32.vlgmr.msra.gmra.mrb[0].mxu1 %vm471_vm1, %v459_v14 }
  0x28   : > { %1187 = vmatmul.mubr.msk.f32.vlgmr.msra.gmra.mrb[0].mxu0 %vm471_vm1, %v459_v14  ;;  %1213 = vmatprep.mubr.msk.f32.mxu1 %vm1420_vm0, %v1421_v1 }
  0x29   : > { %1208 = vmatprep.mubr.msk.f32.mxu0 %vm1420_vm0, %v1421_v1  ;;  %1240 = vmatpush3.bf16.msra.mxu0 %v1239_v18 }
  0x2a   : > { %1241 = vmatprep.subr.bf16.mxu0 %v1419_v0 }
  0x2d   : > { %1243 = vmatpush3.bf16.msra.mxu0 %v1242_v20 }
  0x30   : > { %1209 = vmatmul.mubr.msk.f32.vlgmr.msra.gmra.mrb[2].mxu0 %vm471_vm1, %v459_v14 }
  0xfa   : > { %v622_v23 = vpop.f32.mrb[0].mxu1 }
  0xfb   : > { %v623_v24 = vadd.f32 %v1139_v21, %v622_v23  ;;  %v1199_v25 = vpop.f32.mrb[1].mxu1  ;;  %v541_v26 = vpop.f32.mrb[0].mxu0 }
  0xfc   : > { %v542_v27 = vadd.f32 %v1137_v22, %v541_v26  ;;  %v1188_v28 = vpop.f32.mrb[1].mxu0 }
  0xfd   : > { %1212 = vmatpush3.xpose.msk.msra.mxu1 %vm707_vm2, %v623_v24 }
  0xfe   : > { %1216 = vmatprep.subr.mxu1 %v1421_v1 }
 0x100   : > { %1214 = vmatmul.mubr.msk.f32.vlgmr.msra.gmra.mrb[2].mxu1 %vm707_vm2, %v542_v27 }
 0x101   : > { %1218 = vmatprep.mubr.msk.f32.mxu1 %vm1420_vm0, %v1421_v1 }
 0x103   : > { %v703_v32 = vpop.f32.mrb[2].mxu0 }
 0x104   : > { %v1210_v34 = vpop.f32.mrb[3].mxu0  ;;  %v704_v35 = vadd.f32 %v1141_v33, %v703_v32 }
 0x106   : > { %1217 = vmatpush3.msra.mxu1 %v704_v35 }
 0x1d3   : > { %v780_v29 = vpop.f32.mrb[2].mxu1 }
 0x1d4   : > { %v1215_v30 = vpop.f32.mrb[3].mxu1  ;;  %v784_v31 = vsel %vm707_vm2, %v780_v29, -inf }
 0x1d5   : > { %785 = vmax.xlane.f32.xlu0 %v784_v31 }
 0x262   : > { %v786_v36 = vpop.xlane.xlu0 %785 }
 0x263   : > { %v787_v37 = vsub.f32 %v780_v29, %v786_v36 }
 0x265   : > { %v788_v38 = vmul.f32 1.442695, %v787_v37 }
 0x267   : > { %1319 = vpow2.f32 %v788_v38 }
 0x271   : > { %v1320_v39 = vpop.eup %1319 }
 0x272   : > { %1219 = vmatmul.mubr.msk.f32.vlgmr.msra.gmra.mrb[4].mxu1 %vm707_vm2, %v1320_v39  ;;  %v790_v40 = vsel %vm707_vm2, %v1320_v39, 0.0 }
 0x273   : > { %791 = vadd.xlane.f32.xlu0 %v790_v40 }
 0x300   : > { %v792_v41 = vpop.xlane.xlu0 %791 }
 0x301   : > { %1321 = vrcp.f32 %v792_v41 }
 0x30b   : > { %v1322_v42 = vpop.eup %1321 }
 0x340   : > { %871 = sbr.rel (%p1146_p0) target bundleno = 839 (0x347), region = 60 }
 0x345   : > { %v862_v43 = vpop.f32.mrb[4].mxu1 }
 0x346   : > { %v867_v44 = vmul.f32 %v1322_v42, %v862_v43  ;;  %v1220_v45 = vpop.f32.mrb[5].mxu1 }
 0x347 PF: > { %1221 = vmatprep.subr.mxu0 %v1421_v1  ;;  %v874_v47 = vld [vmem:[%s1568_s19] sm:$0xff]  ;;  %1223 = vmatprep.mubr.msk.f32.mxu0 %vm1420_vm0, %v1421_v1  ;;  %p1148_p1 = scmp.ne.s32.totalorder %s1401_s12, 3 }
 0x348   : > { %1222 = vmatpush3.msra.mxu0 %v874_v47  ;;  %v873_v48 = vld [vmem:[#allocation2] sm:$0xff] }
 0x349   : > { %1224 = vmatmul.mubr.msk.f32.vlgmr.msra.gmra.mrb[4].mxu0 %vm707_vm2, %v867_v44  ;;  %v1149_v53 = vld [vmem:[%s1685_s8] ss:$0 sm:$0xff] (!%p1148_p1) }
 0x419   : > { %953 = sbr.rel (%p1148_p1) target bundleno = 1066 (0x42a), region = 64 }
 0x41c   : > { %v944_v49 = vpop.f32.mrb[4].mxu0 }
 0x41d   : > { %v948_v50 = vadd.f32 %v944_v49, %v873_v48  ;;  %v1225_v51 = vpop.f32.mrb[5].mxu0 }
 0x41f   : > { %949 = vst.msk [vmem:[#allocation2] sm:$0xff] %vm471_vm1, %v948_v50 }
 0x426   : > { %v954_v52 = vld [vmem:[#allocation2] sm:$0xff] }
 0x427   : > { %v962_v54 = vadd.f32 %v1149_v53, %v954_v52 }
 0x429   : > { %963 = vst.msk [vmem:[%s426_s28] sm:$0xff] %vm471_vm1, %v962_v54 }
 0x42a PF: > { %s1151_s19 = sshll.u32 %s1405_s13, 7  ;;  %s978_s12 = sshll.u32 %s426_s28, 4  ;;  %s979_s12 = int_to_ptr.vmem [resolvable:$true] %s978_s12 }
 0x42b   : > { %s1628_s23 = scalar_lea.hbm %s1686_s9, %s1151_s19  ;;  %s1700_s24 = sand.u32 1, %s1393_s10  }
 0x42c   : > { %s965_s20 = scalar_lea.sflag [#allocation4], %s1700_s24  ;;  %s1323_s26 = scalar_lea.vmem %s979_s12, 128 }
 0x42d   : > { %p1324_p2 = scmp.ne.s32.totalorder %s979_s12, %s1323_s26  ;;  %s1423_s17 = smov [#allocation3]  }
 0x42e   : > { %s1327_s29 = sshll.u32 %s1423_s17, 4  ;;  %s1328_s29 = int_to_ptr.vmem [resolvable:$false] %s1327_s29 }
 0x42f   : > { %p1325_p4 = pnand %p1324_p2, %p1523_p3  ;;  %s1329_s14 = scalar_lea.vmem %s1328_s29, 256 }
 0x430   : > { %p1330_p6 = scmp.lt.s32.totalorder %s979_s12, %s1328_s29  ;;  %p1331_p7 = scmp.lt.s32.totalorder %s1329_s14, %s1323_s26 }
 0x431   : > { %p1326_p5 = pneg %p1325_p4 }
 0x432   : > { %p1332_p8 = por %p1331_p7, %p1330_p6 }
 0x434   : > { %p1333_p10 = pnand %p1332_p8, %p1326_p5 }
 0x436   : > { %1336 = shalt.err (!%p1333_p10)
}
 0x437   : > { %s1337_s13 = scalar_lea.hbm %s1628_s23, 128  ;;  %s1341_s27 = scalar_lea.hbm %s1686_s9, 256 }
 0x438   : > { %p1338_p11 = scmp.ne.s32.totalorder %s1628_s23, %s1337_s13  ;;  %p1342_p0 = scmp.lt.u32.totalorder %s1628_s23, %s1686_s9 }
 0x439   : > { %p1343_p1 = scmp.lt.u32.totalorder %s1341_s27, %s1337_s13  ;;  %p1345_p4 = scmp.lt.u32.totalorder %s1337_s13, %s1628_s23 }
 0x43a   : > { %p1339_p12 = pnand %p1338_p11, %p1523_p3 }
 0x43b   : > { %p1344_p2 = por %p1343_p1, %p1342_p0 }
 0x43c   : > { %p1340_p13 = pneg %p1339_p12 }
 0x43d   : > { %p1346_p5 = por %p1345_p4, %p1344_p2 }
 0x43f   : > { %p1347_p6 = pnand %p1346_p5, %p1340_p13 }
 0x441   : > { %1350 = shalt.err (!%p1347_p6)
}
 0x442   : > { %1244 = dma.vmem_to_hbm [thread:$0]  (%p1523_p3), %s979_s12, 128, %s1628_s23, %s965_s20  }
 0x443 PF: > { %p1250_p7 = scmp.ge.s32.totalorder %s1417_s16, 2  ;;  %s990_s25 = sand.u32 1, %s1389_s30  }
 0x444   : > { %s991_s18 = scalar_lea.sflag [#allocation4], %s990_s25 }
 0x445   : > { %p1247_p8 = pnand %p1250_p7, %p1533_p9 }
 0x447   : > { %1384 = dma.done.wait (!%p1247_p8), %s991_s18, 128  }
 0x448   : > { %1386 = vsyncadd (!%p1247_p8), %s991_s18, 4294967168  ;;  %s22_s16 = sadd.s32 1, %s1417_s16   ;;  %s1701_s24 = sld [smem:[#allocation6_spill]] }
 0x449   : > { %p19_p10 = scmp.ge.s32.totalorder %s22_s16, 10   ;;  %s1702_s11 = sld [smem:[#allocation11_spill]] }
 0x44a   : > { %s1703_s12 = sld [smem:[#allocation7_spill]]  ;;  %s1704_s13 = sld [smem:[#allocation8_spill]] }
 0x44b   : > { %s1705_s14 = sld [smem:[#allocation9_spill]]  ;;  %s1706_s15 = sld [smem:[#allocation10_spill]] }
 0x44c   : > { %s1707_s30 = smov %s1393_s10  ;;  %21 = sbr.rel (!%p19_p10) target bundleno = 5 (0x5), region = 120 }
 0x44e   : > { %s1708_s10 = smov %s1701_s24 }
 0x453   :  { %996 = vsyncpa [#allocation4], 1 }
 0x454   :  { %998 = vsyncpa [#allocation4 + $0x1], 1 }

</bundles_post_ra>
